<compile_context>
chip_gen: v7x
topology: tpu7x:2x2x1
jax: 0.10.0
libtpu: 0.0.40
codegen_flags: <defaults>
</compile_context>

<pallas_src>
import jax
import jax.numpy as jnp
from jax import lax
from jax.experimental import pallas as pl
from jax.experimental.pallas import tpu as pltpu

LANES = 128
SUBLANE_PACK = 16        # row-tile granularity safe for both f32 (8) and bf16 (16)
MAX_TILE_ROWS = 8192     # 8192 x 128 x 4B = 4 MiB per f32 buffer (x2 double-buffered)


def _make_kernel(tile_rows, total_rows, needs_mask):
    def _partial(v):
        # min(x, 0) in the native dtype (bf16 stays bf16 on v6e/v7x), f32 accumulate.
        return jnp.sum(v.astype(jnp.float32), axis=0, keepdims=True)

    if not needs_mask:
        # Fast path: rows % tile_rows == 0 -> no tail masking anywhere.
        def kernel(x_ref, o_ref):
            o_ref[...] = _partial(jnp.minimum(x_ref[...], 0))

        return kernel

    def kernel(x_ref, o_ref):
        i = pl.program_id(0)
        last = pl.num_programs(0) - 1

        @pl.when(i != last)
        def _():
            o_ref[...] = _partial(jnp.minimum(x_ref[...], 0))

        @pl.when(i == last)
        def _():
            # Only the ragged last tile pays the iota + compare + select.
            v = jnp.minimum(x_ref[...], 0)
            row = i * tile_rows + lax.broadcasted_iota(
                jnp.int32, (tile_rows, LANES), 0
            )
            v = jnp.where(row < total_rows, v, 0)
            o_ref[...] = _partial(v)

    return kernel


def one_sided(x):
    """output = -mean(relu(-x)) == mean(min(x, 0)), matching PyTorch ONE_SIDED."""
    n_elem = x.size  # Python int at trace time -> 1/N baked as a constant
    if n_elem == 0:
        return jnp.float32(jnp.nan)  # matches torch.mean of an empty tensor
    if x.dtype not in (jnp.float32, jnp.bfloat16):
        x = x.astype(jnp.float32)
    flat = x.reshape(-1)

    # No full-array pad copy: kernel consumes the 128-aligned prefix, the
    # <=127-element remainder is summed with a tiny pure-JAX op below.
    n_main = (n_elem // LANES) * LANES
    rem = n_elem - n_main

    total = jnp.float32(0.0)
    if n_main > 0:
        slab = flat[:n_main].reshape(-1, LANES)
        rows = slab.shape[0]

        # Large tiles amortize per-grid-step overhead; 4 MiB/buffer (f32) keeps
        # 2x-buffered inputs well inside every generation's scoped VMEM.
        tile_rows = min(MAX_TILE_ROWS, pl.cdiv(rows, SUBLANE_PACK) * SUBLANE_PACK)
        num_tiles = pl.cdiv(rows, tile_rows)
        needs_mask = (rows % tile_rows) != 0

        # Note: on v7x one could additionally sweep pipeline_mode=pl.Buffered(3)
        # on the input spec if the profile shows exposed DMA issue gaps.
        partials = pl.pallas_call(
            _make_kernel(tile_rows, rows, needs_mask),
            out_shape=jax.ShapeDtypeStruct((num_tiles, LANES), jnp.float32),
            grid=(num_tiles,),
            in_specs=[pl.BlockSpec((tile_rows, LANES), lambda i: (i, 0))],
            out_specs=pl.BlockSpec((1, LANES), lambda i: (i, 0)),
            compiler_params=pltpu.CompilerParams(
                dimension_semantics=("parallel",),
                vmem_limit_bytes=32 * 1024 * 1024,
            ),
        )(slab)
        total = total + jnp.sum(partials)

    if rem > 0:
        tail = flat[n_main:]
        total = total + jnp.sum(jnp.minimum(tail, 0).astype(jnp.float32))

    # -mean(relu(-x)) == mean(min(x, 0)); sign already folded, just scale by 1/N.
    return total * (1.0 / n_elem)


if __name__ == "__main__":
    key = jax.random.PRNGKey(0)
    # NCHW-style input consistent with typical usage of this critic output module.
    x = jax.random.normal(key, (2, 4, 16, 16), dtype=jnp.float32)

    result = jax.block_until_ready(one_sided(x))

    # Reference check in plain JAX.
    ref = -jnp.mean(jnp.maximum(-x, 0.0))
    assert jnp.allclose(result, ref, atol=1e-5, rtol=1e-5), (result, ref)

    print("KERNEL_OK")
</pallas_src>

<mosaic_0001>
module attributes {stable_mosaic.version = 11 : i64} {
  func.func @kernel(%arg0: i32, %arg1: memref<16x128xf32, #tpu.memory_space<vmem>>, %arg2: memref<1x128xf32, #tpu.memory_space<vmem>>) attributes {dimension_semantics = [#tpu.dimension_semantics<parallel>], iteration_bounds = array<i64: 1>, scalar_prefetch = 0 : i64, scratch_operands = 0 : i64, tpu.core_type = #tpu.core_type<tc>, window_params = [{transform_indices = @transform_0, window_bounds = array<i64: 16, 128>}, {transform_indices = @transform_1, window_bounds = array<i64: 1, 128>}]} {
    %c0 = arith.constant 0 : index
    %c0_0 = arith.constant 0 : index
    %0 = vector.load %arg1[%c0, %c0_0] : memref<16x128xf32, #tpu.memory_space<vmem>>, vector<16x128xf32>
    %cst = arith.constant 0.000000e+00 : f32
    %1 = vector.broadcast %cst : f32 to vector<16x128xf32>
    %2 = arith.minimumf %0, %1 : vector<16x128xf32>
    %cst_1 = arith.constant dense<0.000000e+00> : vector<128xf32>
    %3 = vector.multi_reduction <add>, %2, %cst_1 [0] : vector<16x128xf32> to vector<128xf32>
    %4 = vector.shape_cast %3 : vector<128xf32> to vector<1x128xf32>
    %c0_2 = arith.constant 0 : index
    %c0_3 = arith.constant 0 : index
    %5 = vector.load %arg2[%c0_2, %c0_3] : memref<1x128xf32, #tpu.memory_space<vmem>>, vector<1x128xf32>
    tpu.vector_store %arg2[%c0_2, %c0_3], %4 {strides = array<i32>} : memref<1x128xf32, #tpu.memory_space<vmem>>, vector<1x128xf32>,
    return
  }
  func.func @transform_0(%arg0: i32) -> (i32, i32) {
    %c0_i32 = arith.constant 0 : i32
    %c0_i32_0 = arith.constant 0 : i32
    return %arg0, %c0_i32 : i32, i32
  }
  func.func @transform_1(%arg0: i32) -> (i32, i32) {
    %c0_i32 = arith.constant 0 : i32
    %c0_i32_0 = arith.constant 0 : i32
    return %arg0, %c0_i32 : i32, i32
  }
}

</mosaic_0001>

<bundles_post_ra>
// kernel: tpu_custom_call.1
= control target key start
LH: loop header
LB: loop body
LE: loop exit
PB: predicated region body
PF: predicated region fallthrough
CT: control target
= control target key end

     0   :  { %6 = vsyncpa [#allocation3], 0  ;;  %s140_s0 = inlined_call_operand.hbm [shape: f32[16,128], index: 0, kind: input, shape index: {}]   ;;  %s141_s1 = inlined_call_operand.hbm [shape: f32[1,128], index: 1, kind: output, shape index: {}]  }
   0x1   :  { %7 = vsyncpa [#allocation4], 0  ;;  %s102_s6 = smov [#allocation2]   ;;  %s54_s10 = scalar_lea.hbm %s140_s0, 256 }
   0x2   :  { %s13_s7 = sshll.u32 %s102_s6, 4  ;;  %p55_p0 = scmp.ne.s32.totalorder %s140_s0, %s54_s10  ;;  %s14_s7 = int_to_ptr.vmem [resolvable:$true] %s13_s7 }
   0x3   :  { %p58_p1 = scmp.lt.u32.totalorder %s54_s10, %s140_s0 }
   0x5   :  { %p60_p2 = pnand %p58_p1, %p55_p0 }
   0x7   :  { %63 = shalt.err (!%p60_p2)
}
   0x8   :  { %s64_s15 = scalar_lea.vmem %s14_s7, 256  ;;  %p69_p4 = scmp.lt.s32.totalorder %s14_s7, %s14_s7 }
   0x9   :  { %p65_p3 = scmp.ne.s32.totalorder %s14_s7, %s64_s15  ;;  %p70_p5 = scmp.lt.s32.totalorder %s64_s15, %s64_s15 }
   0xb   :  { %p71_p6 = por %p70_p5, %p69_p4 }
   0xd   :  { %p72_p7 = pnand %p71_p6, %p65_p3 }
   0xf   :  { %75 = shalt.err (!%p72_p7)
}
  0x10   :  { %s103_s16 = smov 128   ;;  %s104_s17 = smov 8  }
  0x11   :  { %19 = dma.hbm_to_vmem [thread:$0]  %s140_s0, 256, %s14_s7, [#allocation3], %s103_s16, %s103_s16, %s104_s17  }
  0x12   :  { %98 = dma.done.wait [#allocation3], 256  }
  0x13   :  { %99 = vsyncadd [#allocation3], 4294967040  ;;  %v23_v0 = vld [vmem:[#allocation2] sm:$0xff]  ;;  %v24_v1 = vld [vmem:[#allocation2 + $0x8] sm:$0xff]  ;;  %s105_s20 = smov [#allocation5]  }
  0x14   :  { %v25_v2 = vmin.f32 %v23_v0, 0.0  ;;  %v26_v3 = vmin.f32 %v24_v1, 0.0  ;;  %s41_s21 = sshll.u32 %s105_s20, 4  ;;  %s42_s21 = int_to_ptr.vmem [resolvable:$true] %s41_s21 }
  0x15   :  { %s76_s22 = scalar_lea.vmem %s42_s21, 16  ;;  %s80_s0 = scalar_lea.vmem %s42_s21, 32 }
  0x16   :  { %v27_v4 = vadd.f32 %v26_v3, %v25_v2  ;;  %p77_p8 = scmp.ne.s32.totalorder %s42_s21, %s76_s22  ;;  %p81_p9 = scmp.lt.s32.totalorder %s42_s21, %s42_s21 }
  0x17   :  { %p82_p10 = scmp.lt.s32.totalorder %s80_s0, %s76_s22 }
  0x18   :  { %v28_v5 = vrot.slane %v27_v4, 4 }
  0x19   :  { %p83_p11 = por %p82_p10, %p81_p9 }
  0x1a   :  { %v29_v6 = vadd.f32 %v28_v5, %v27_v4 }
  0x1b   :  { %p84_p12 = pnand %p83_p11, %p77_p8 }
  0x1c   :  { %v30_v7 = vrot.slane %v29_v6, 2 }
  0x1e   :  { %v31_v8 = vadd.f32 %v30_v7, %v29_v6 }
  0x20   :  { %v32_v9 = vrot.slane %v31_v8, 1 }
  0x22   :  { %v33_v10 = vadd.f32 %v32_v9, %v31_v8 }
  0x24   :  { %34 = vst [vmem:[#allocation5] sm:$0x1] %v33_v10 }
  0x25   :  { %87 = shalt.err (!%p84_p12)
}
  0x26   :  { %s88_s25 = scalar_lea.hbm %s141_s1, 16 }
  0x27   :  { %p89_p13 = scmp.ne.s32.totalorder %s141_s1, %s88_s25  ;;  %p92_p0 = scmp.lt.u32.totalorder %s88_s25, %s141_s1 }
  0x29   :  { %p94_p1 = pnand %p92_p0, %p89_p13 }
  0x2b   :  { %97 = shalt.err (!%p94_p1)
}
  0x2c   :  { %44 = dma.vmem_to_hbm [thread:$0]  %s42_s21, 16, %s141_s1, [#allocation4]  }
  0x2d   :  { %100 = dma.done.wait [#allocation4], 16  }
  0x2e   :  { %101 = vsyncadd [#allocation4], 4294967280 }
  0x2f   :  { %48 = vsyncpa [#allocation3], 1 }
  0x30   :  { %49 = vsyncpa [#allocation4], 1 }

</bundles_post_ra>
